<compile_context>
chip_gen: v6e
topology: v6e:2x2x1
jax: 0.10.0
libtpu: 0.0.40
codegen_flags: <defaults>
</compile_context>

<pallas_src>
import jax
import jax.numpy as jnp
from jax.experimental import pallas as pl
from jax.experimental.pallas import tpu as pltpu

_LANE = 128
_SUBLANE = 8
_PIPELINE_MODE_OK = None   # lazily probed: does this JAX accept pipeline_mode=pl.Buffered(n)?


def _round_up(x, m):
    return ((x + m - 1) // m) * m


# --------------------------------------------------------------------------- kernels
def _fused_kernel(x_ref, w1_ref, b1_ref, w2_ref, b2_ref, o_ref):
    """Whole embed dim resident: (x @ w1 + b1).relu() @ w2 + b2, no scratch."""
    h = jnp.dot(x_ref[...], w1_ref[...], preferred_element_type=jnp.float32)
    h = jnp.maximum(h + b1_ref[...], 0.0)                 # f32 bias + ReLU (VPU-safe on v5e)
    y = jnp.dot(h.astype(w2_ref.dtype), w2_ref[...],
                preferred_element_type=jnp.float32)
    o_ref[...] = (y + b2_ref[...]).astype(o_ref.dtype)


def _ksplit_kernel(x_ref, w1_ref, b1_ref, w2_ref, b2_ref, o_ref, h_acc):
    """Embed dim split over grid axis 1; f32 accumulator, assign-on-first-k."""
    k = pl.program_id(1)
    part = jnp.dot(x_ref[...], w1_ref[...], preferred_element_type=jnp.float32)

    @pl.when(k == 0)
    def _():
        h_acc[...] = part                                  # no zero-init + load/add round trip

    @pl.when(k != 0)
    def _():
        h_acc[...] += part

    @pl.when(k == pl.num_programs(1) - 1)
    def _():
        h = jnp.maximum(h_acc[...] + b1_ref[...], 0.0)
        y = jnp.dot(h.astype(w2_ref.dtype), w2_ref[...],
                    preferred_element_type=jnp.float32)
        o_ref[...] = (y + b2_ref[...]).astype(o_ref.dtype)


# --------------------------------------------------------------------------- hw / feature probes
def _tpu_generation():
    """(physical VMEM bytes per TensorCore, whether the chip has 2 TCs)."""
    kind = ""
    try:
        kind = (jax.devices()[0].device_kind or "").lower()
    except Exception:
        pass
    multi_tc = "v7" in kind

    phys = 0
    try:
        info = pltpu.get_tpu_info()
        for attr in ("vmem_capacity_bytes", "vmem_size_bytes", "vmem_bytes"):
            v = getattr(info, attr, None)
            if v:
                phys = int(v)
                break
    except Exception:
        phys = 0
    if phys <= 0:
        if multi_tc:
            phys = 64 << 20                   # v7x
        elif "v2" in kind or "v3" in kind:
            phys = 16 << 20
        else:
            phys = 128 << 20                  # v4 / v5e / v5p / v6e
    if multi_tc:
        phys = min(phys, 64 << 20)            # per-TensorCore on v7x
    return max(phys, 32 << 20), multi_tc


def _probe_copy_kernel(a_ref, o_ref):
    o_ref[...] = a_ref[...]


def _pipeline_mode_supported():
    """Probe (once) whether BlockSpec(pipeline_mode=pl.Buffered(n)) lowers on
    this JAX/Mosaic version.  Uses a tiny dedicated kernel so a failure here
    can only be about pipeline_mode support and never masks real errors."""
    global _PIPELINE_MODE_OK
    if _PIPELINE_MODE_OK is not None:
        return _PIPELINE_MODE_OK
    if not hasattr(pl, "Buffered"):
        _PIPELINE_MODE_OK = False
        return _PIPELINE_MODE_OK
    try:
        x = jnp.zeros((8, 128), jnp.float32)
        out = pl.pallas_call(
            _probe_copy_kernel,
            out_shape=jax.ShapeDtypeStruct((16, 128), jnp.float32),
            grid=(2,),
            in_specs=[pl.BlockSpec((8, 128), lambda i: (0, 0),
                                   pipeline_mode=pl.Buffered(1))],
            out_specs=pl.BlockSpec((8, 128), lambda i: (i, 0)),
        )(x)
        jax.block_until_ready(out)
        _PIPELINE_MODE_OK = True
    except Exception:
        _PIPELINE_MODE_OK = False
    return _PIPELINE_MODE_OK


# --------------------------------------------------------------------------- tiling
def _footprint_bytes(bt, kt, E, H, Qp, in_bytes, out_bytes):
    """Resident VMEM bytes for a (batch_tile, k_tile) choice."""
    nk = E // kt
    fixed = ((2 if nk > 1 else 1) * kt * H * in_bytes      # w1 (dbl-buffered only if k varies)
             + H * Qp * in_bytes                           # w2 (single-buffered constant)
             + (H + Qp) * 4)                               # f32 biases
    stream = ((3 if nk > 1 else 2) * bt * kt * in_bytes    # streamed x buffers
              + 2 * bt * Qp * out_bytes                    # streamed output buffers
              + (bt * H * 4 if nk > 1 else 0))             # f32 hidden accumulator
    return fixed + stream


def _select_tiling(B, E, H, Qp, in_bytes, out_bytes, budget, multi_tc):
    # ---- K (embed) tile: keep all of E resident unless w1 is too big. ------
    k_tile = E
    if E % _LANE == 0 and E * H * in_bytes > budget // 2:
        cands = [c for c in range(_LANE, E, _LANE)
                 if E % c == 0 and 2 * c * H * in_bytes <= budget // 2]
        if cands:
            k_tile = max(cands)            # biggest fitting K tile -> fewest k steps
    # TODO(synk): for very large H on v7x (64 MiB VMEM), tile H as a third grid
    # axis (accumulating into a (bt, Qp) f32 scratch) instead of shrinking tiles.

    # ---- batch tile ---------------------------------------------------------
    cands = [d for d in range(_SUBLANE, min(B, 1024) + 1, _SUBLANE) if B % d == 0]
    fit = [d for d in cands
           if _footprint_bytes(d, k_tile, E, H, Qp, in_bytes, out_bytes) <= budget]

    pool = fit
    if multi_tc and fit:
        # v7x: two TensorCores share the 'parallel' batch axis -> prefer >=4
        # grid steps (load balance + pipelining), fall back to >=2, then any.
        pool = ([d for d in fit if B // d >= 4]
                or [d for d in fit if B // d >= 2]
                or fit)

    if pool:
        batch_tile = max(pool)
        # Mild bias toward MXU-M-friendly multiples of 256 when comparable.
        m256 = [d for d in pool if d % 256 == 0]
        if m256 and 2 * max(m256) >= batch_tile:
            batch_tile = max(m256)
    elif cands:
        batch_tile = min(cands)            # nothing fits the budget: smallest legal tile
    else:
        batch_tile = B                     # tiny / non-multiple-of-8 batch: full block
    return batch_tile, k_tile


# --------------------------------------------------------------------------- pallas_call builder
def _build_call(*, B, E, H, Qp, batch_tile, k_tile, out_dtype, vmem_limit,
                buffered_ok):
    nb = B // batch_tile
    nk = E // k_tile
    # Grid-invariant blocks (biases, w2, and w1 when fully resident) need only
    # a single VMEM buffer.
    const_kw = {"pipeline_mode": pl.Buffered(1)} if buffered_ok else {}

    if nk == 1:
        in_specs = [
            pl.BlockSpec((batch_tile, k_tile), lambda i: (i, 0)),        # x (streamed)
            pl.BlockSpec((k_tile, H), lambda i: (0, 0), **const_kw),     # w1 (resident)
            pl.BlockSpec((1, H), lambda i: (0, 0), **const_kw),          # b1
            pl.BlockSpec((H, Qp), lambda i: (0, 0), **const_kw),         # w2
            pl.BlockSpec((1, Qp), lambda i: (0, 0), **const_kw),         # b2
        ]
        return pl.pallas_call(
            _fused_kernel,
            out_shape=jax.ShapeDtypeStruct((B, Qp), out_dtype),
            grid_spec=pltpu.PrefetchScalarGridSpec(
                num_scalar_prefetch=0,
                grid=(nb,),
                in_specs=in_specs,
                out_specs=pl.BlockSpec((batch_tile, Qp), lambda i: (i, 0)),
            ),
            compiler_params=pltpu.CompilerParams(
                dimension_semantics=("parallel",),
                vmem_limit_bytes=vmem_limit),
        )

    # K-split path: deeper buffering on the streamed x tiles helps hide DMA
    # when the per-step matmul is short (only worthwhile with enough k steps).
    x_kw = ({"pipeline_mode": pl.Buffered(3)} if (buffered_ok and nk >= 3) else {})
    in_specs = [
        pl.BlockSpec((batch_tile, k_tile), lambda i, k: (i, k), **x_kw),  # x
        pl.BlockSpec((k_tile, H), lambda i, k: (k, 0)),                   # w1 (streamed over k)
        pl.BlockSpec((1, H), lambda i, k: (0, 0), **const_kw),            # b1
        pl.BlockSpec((H, Qp), lambda i, k: (0, 0), **const_kw),           # w2
        pl.BlockSpec((1, Qp), lambda i, k: (0, 0), **const_kw),           # b2
    ]
    return pl.pallas_call(
        _ksplit_kernel,
        out_shape=jax.ShapeDtypeStruct((B, Qp), out_dtype),
        grid_spec=pltpu.PrefetchScalarGridSpec(
            num_scalar_prefetch=0,
            grid=(nb, nk),
            in_specs=in_specs,
            out_specs=pl.BlockSpec((batch_tile, Qp), lambda i, k: (i, 0)),
            scratch_shapes=[pltpu.VMEM((batch_tile, H), jnp.float32)],
        ),
        compiler_params=pltpu.CompilerParams(
            dimension_semantics=("parallel", "arbitrary"),
            vmem_limit_bytes=vmem_limit),
    )


# --------------------------------------------------------------------------- public wrappers
def make_value_head(w1, b1, w2, b2, *, use_bf16=True, batch_tile=None,
                    k_tile=None, return_padded=False):
    """Prepare (cast / pad) the weights ONCE and return `apply(x) -> [B, Q]`.

    w1: [E, H], b1: [H], w2: [H, Q], b2: [Q]  (transposed vs. nn.Linear).
    """
    E, H = w1.shape
    Q = w2.shape[1]
    Qp = _round_up(max(Q, _LANE), _LANE)          # lane-dense output stores
    w_dtype = jnp.bfloat16 if use_bf16 else jnp.dtype(w1.dtype)

    # Weight prep happens once per head, not per forward call.
    w1c = jnp.asarray(w1, w_dtype)
    w2p = jnp.zeros((H, Qp), w_dtype).at[:, :Q].set(jnp.asarray(w2, w_dtype))
    b1r = jnp.asarray(b1, jnp.float32).reshape(1, H)
    b2p = jnp.zeros((1, Qp), jnp.float32).at[0, :Q].set(jnp.asarray(b2, jnp.float32))

    phys_vmem, multi_tc = _tpu_generation()
    budget = (phys_vmem * 7) // 10                # ~90 MiB on v5e/v6e, ~44 MiB on v7x
    limit_cap = max(phys_vmem - (16 << 20), 24 << 20)
    buffered_ok = _pipeline_mode_supported()

    @jax.jit
    def apply(x):
        B = x.shape[0]
        assert x.shape[1] == E, "x last dim must equal embed_dim"
        out_dtype = x.dtype
        in_bytes = jnp.dtype(w_dtype).itemsize
        out_bytes = jnp.dtype(out_dtype).itemsize

        tb_auto, tk_auto = _select_tiling(B, E, H, Qp, in_bytes, out_bytes,
                                          budget, multi_tc)
        bt = batch_tile if batch_tile is not None else tb_auto
        kt = k_tile if k_tile is not None else tk_auto

        assert B % bt == 0, "batch_tile must divide batch"
        assert bt == B or bt % _SUBLANE == 0, "batch_tile must be a multiple of 8"
        assert E % kt == 0, "k_tile must divide embed_dim"
        assert kt == E or kt % _LANE == 0, "k_tile must be a multiple of 128 (or E)"

        needed = _footprint_bytes(bt, kt, E, H, Qp, in_bytes, out_bytes)
        vmem_limit = int(min(limit_cap, max(needed + (8 << 20), 24 << 20)))

        call = _build_call(B=B, E=E, H=H, Qp=Qp, batch_tile=bt, k_tile=kt,
                           out_dtype=out_dtype, vmem_limit=vmem_limit,
                           buffered_ok=buffered_ok)
        xk = x.astype(w_dtype) if use_bf16 else x
        out_padded = call(xk, w1c, b1r, w2p, b2p)
        return out_padded if return_padded else out_padded[:, :Q]

    return apply


def value_head(x, w1, b1, w2, b2, **kwargs):
    """One-shot convenience wrapper: builds the head and applies it to x."""
    return make_value_head(w1, b1, w2, b2, **kwargs)(x)


# --------------------------------------------------------------------------- tests
if __name__ == "__main__":
    key = jax.random.PRNGKey(0)

    def make_inputs(k, batch, embed_dim, hidden_dim, num_quantiles):
        kx, kw1, kb1, kw2, kb2 = jax.random.split(k, 5)
        x = jax.random.normal(kx, (batch, embed_dim), dtype=jnp.float32)
        lim1 = 1.0 / jnp.sqrt(embed_dim)
        lim2 = 1.0 / jnp.sqrt(hidden_dim)
        w1 = jax.random.uniform(kw1, (embed_dim, hidden_dim), jnp.float32, -lim1, lim1)
        b1 = jax.random.uniform(kb1, (hidden_dim,), jnp.float32, -lim1, lim1)
        w2 = jax.random.uniform(kw2, (hidden_dim, num_quantiles), jnp.float32, -lim2, lim2)
        b2 = jax.random.uniform(kb2, (num_quantiles,), jnp.float32, -lim2, lim2)
        return x, w1, b1, w2, b2

    def ref(x, w1, b1, w2, b2):
        return jnp.maximum(x @ w1 + b1, 0.0) @ w2 + b2

    k1, k2, k3 = jax.random.split(key, 3)

    # 1) Module-default dims, bf16 MXU path, auto tiling (fused nk==1 kernel).
    x, w1, b1, w2, b2 = make_inputs(k1, batch=16, embed_dim=256,
                                    hidden_dim=256, num_quantiles=8)
    head = make_value_head(w1, b1, w2, b2)                 # weights cast / padded once
    out = jax.block_until_ready(head(x))
    assert out.shape == (16, 8)
    assert jnp.allclose(out, ref(x, w1, b1, w2, b2), atol=6e-2, rtol=6e-2), \
        "mismatch (bf16 fused)"

    # 2) f32 path (no bf16 cast) on a small shape: tight check of the wiring.
    xs, w1s, b1s, w2s, b2s = make_inputs(k2, batch=16, embed_dim=32,
                                         hidden_dim=32, num_quantiles=8)
    out = jax.block_until_ready(value_head(xs, w1s, b1s, w2s, b2s, use_bf16=False))
    assert out.shape == (16, 8)
    assert jnp.allclose(out, ref(xs, w1s, b1s, w2s, b2s), atol=1e-5, rtol=1e-5), \
        "mismatch (f32 fused)"

    # 3) Force a K split (embed streamed over 2 grid steps) to exercise the
    #    accumulator kernel with assign-on-first-k.
    xk, w1k, b1k, w2k, b2k = make_inputs(k3, batch=16, embed_dim=256,
                                         hidden_dim=64, num_quantiles=8)
    out = jax.block_until_ready(value_head(xk, w1k, b1k, w2k, b2k,
                                           use_bf16=False, k_tile=128))
    assert out.shape == (16, 8)
    assert jnp.allclose(out, ref(xk, w1k, b1k, w2k, b2k), atol=1e-5, rtol=1e-5), \
        "mismatch (f32 k-split)"

    print("KERNEL_OK")
</pallas_src>

<mosaic_0001>
module attributes {stable_mosaic.version = 11 : i64} {
  func.func @_probe_copy_kernel(%arg0: i32, %arg1: memref<8x128xf32, #tpu.memory_space<vmem>>, %arg2: memref<8x128xf32, #tpu.memory_space<vmem>>) attributes {dimension_semantics = [#tpu.dimension_semantics<arbitrary>], iteration_bounds = array<i64: 2>, scalar_prefetch = 0 : i64, scratch_operands = 0 : i64, tpu.core_type = #tpu.core_type<tc>, window_params = [{pipeline_mode = #tpu.pipeline_mode<synchronous>, transform_indices = @transform_0, window_bounds = array<i64: 8, 128>}, {transform_indices = @transform_1, window_bounds = array<i64: 8, 128>}]} {
    %c0 = arith.constant 0 : index
    %c0_0 = arith.constant 0 : index
    %0 = vector.load %arg1[%c0, %c0_0] : memref<8x128xf32, #tpu.memory_space<vmem>>, vector<8x128xf32>
    %c0_1 = arith.constant 0 : index
    %c0_2 = arith.constant 0 : index
    %1 = vector.load %arg2[%c0_1, %c0_2] : memref<8x128xf32, #tpu.memory_space<vmem>>, vector<8x128xf32>
    tpu.vector_store %arg2[%c0_1, %c0_2], %0 {strides = array<i32>} : memref<8x128xf32, #tpu.memory_space<vmem>>, vector<8x128xf32>,
    return
  }
  func.func @transform_0(%arg0: i32) -> (i32, i32) {
    %c0_i32 = arith.constant 0 : i32
    %c0_i32_0 = arith.constant 0 : i32
    %c0_i32_1 = arith.constant 0 : i32
    return %c0_i32, %c0_i32_0 : i32, i32
  }
  func.func @transform_1(%arg0: i32) -> (i32, i32) {
    %c0_i32 = arith.constant 0 : i32
    %c0_i32_0 = arith.constant 0 : i32
    return %arg0, %c0_i32 : i32, i32
  }
}

module attributes {stable_mosaic.version = 11 : i64} {
  func.func @_fused_kernel(%arg0: i32, %arg1: memref<16x256xbf16, #tpu.memory_space<vmem>>, %arg2: memref<256x256xbf16, #tpu.memory_space<vmem>>, %arg3: memref<1x256xf32, #tpu.memory_space<vmem>>, %arg4: memref<256x128xbf16, #tpu.memory_space<vmem>>, %arg5: memref<1x128xf32, #tpu.memory_space<vmem>>, %arg6: memref<16x128xf32, #tpu.memory_space<vmem>>) attributes {dimension_semantics = [#tpu.dimension_semantics<parallel>], iteration_bounds = array<i64: 1>, scalar_prefetch = 0 : i64, scratch_operands = 0 : i64, tpu.core_type = #tpu.core_type<tc>, window_params = [{transform_indices = @transform_0, window_bounds = array<i64: 16, 256>}, {pipeline_mode = #tpu.pipeline_mode<synchronous>, transform_indices = @transform_1, window_bounds = array<i64: 256, 256>}, {pipeline_mode = #tpu.pipeline_mode<synchronous>, transform_indices = @transform_2, window_bounds = array<i64: 1, 256>}, {pipeline_mode = #tpu.pipeline_mode<synchronous>, transform_indices = @transform_3, window_bounds = array<i64: 256, 128>}, {pipeline_mode = #tpu.pipeline_mode<synchronous>, transform_indices = @transform_4, window_bounds = array<i64: 1, 128>}, {transform_indices = @transform_5, window_bounds = array<i64: 16, 128>}]} {
    %c0 = arith.constant 0 : index
    %c0_0 = arith.constant 0 : index
    %0 = vector.load %arg1[%c0, %c0_0] : memref<16x256xbf16, #tpu.memory_space<vmem>>, vector<16x256xbf16>
    %c0_1 = arith.constant 0 : index
    %c0_2 = arith.constant 0 : index
    %1 = vector.load %arg2[%c0_1, %c0_2] : memref<256x256xbf16, #tpu.memory_space<vmem>>, vector<256x256xbf16>
    %cst = arith.constant dense<0.000000e+00> : vector<16x256xf32>
    %2 = tpu.matmul %0, %1, %cst {dimension_numbers = #tpu.dot_dimension_numbers<[1], [0], [0], [1], [0, 0, 1, 1], [], []>} : vector<16x256xbf16>, vector<256x256xbf16>, vector<16x256xf32> -> vector<16x256xf32>
    %c0_3 = arith.constant 0 : index
    %c0_4 = arith.constant 0 : index
    %3 = vector.load %arg3[%c0_3, %c0_4] : memref<1x256xf32, #tpu.memory_space<vmem>>, vector<1x256xf32>
    %4 = vector.broadcast %3 : vector<1x256xf32> to vector<16x256xf32>
    %5 = arith.addf %2, %4 : vector<16x256xf32>
    %cst_5 = arith.constant 0.000000e+00 : f32
    %6 = vector.broadcast %cst_5 : f32 to vector<16x256xf32>
    %7 = arith.maximumf %5, %6 : vector<16x256xf32>
    %8 = arith.truncf %7 : vector<16x256xf32> to vector<16x256xbf16>
    %c0_6 = arith.constant 0 : index
    %c0_7 = arith.constant 0 : index
    %9 = vector.load %arg4[%c0_6, %c0_7] : memref<256x128xbf16, #tpu.memory_space<vmem>>, vector<256x128xbf16>
    %cst_8 = arith.constant dense<0.000000e+00> : vector<16x128xf32>
    %10 = tpu.matmul %8, %9, %cst_8 {dimension_numbers = #tpu.dot_dimension_numbers<[1], [0], [0], [1], [0, 0, 1, 1], [], []>} : vector<16x256xbf16>, vector<256x128xbf16>, vector<16x128xf32> -> vector<16x128xf32>
    %c0_9 = arith.constant 0 : index
    %c0_10 = arith.constant 0 : index
    %11 = vector.load %arg5[%c0_9, %c0_10] : memref<1x128xf32, #tpu.memory_space<vmem>>, vector<1x128xf32>
    %12 = vector.broadcast %11 : vector<1x128xf32> to vector<16x128xf32>
    %13 = arith.addf %10, %12 : vector<16x128xf32>
    %c0_11 = arith.constant 0 : index
    %c0_12 = arith.constant 0 : index
    %14 = vector.load %arg6[%c0_11, %c0_12] : memref<16x128xf32, #tpu.memory_space<vmem>>, vector<16x128xf32>
    tpu.vector_store %arg6[%c0_11, %c0_12], %13 {strides = array<i32>} : memref<16x128xf32, #tpu.memory_space<vmem>>, vector<16x128xf32>,
    return
  }
  func.func @transform_0(%arg0: i32) -> (i32, i32) {
    %c0_i32 = arith.constant 0 : i32
    %c0_i32_0 = arith.constant 0 : i32
    return %arg0, %c0_i32 : i32, i32
  }
  func.func @transform_1(%arg0: i32) -> (i32, i32) {
    %c0_i32 = arith.constant 0 : i32
    %c0_i32_0 = arith.constant 0 : i32
    %c0_i32_1 = arith.constant 0 : i32
    return %c0_i32, %c0_i32_0 : i32, i32
  }
  func.func @transform_2(%arg0: i32) -> (i32, i32) {
    %c0_i32 = arith.constant 0 : i32
    %c0_i32_0 = arith.constant 0 : i32
    %c0_i32_1 = arith.constant 0 : i32
    return %c0_i32, %c0_i32_0 : i32, i32
  }
  func.func @transform_3(%arg0: i32) -> (i32, i32) {
    %c0_i32 = arith.constant 0 : i32
    %c0_i32_0 = arith.constant 0 : i32
    %c0_i32_1 = arith.constant 0 : i32
    return %c0_i32, %c0_i32_0 : i32, i32
  }
  func.func @transform_4(%arg0: i32) -> (i32, i32) {
    %c0_i32 = arith.constant 0 : i32
    %c0_i32_0 = arith.constant 0 : i32
    %c0_i32_1 = arith.constant 0 : i32
    return %c0_i32, %c0_i32_0 : i32, i32
  }
  func.func @transform_5(%arg0: i32) -> (i32, i32) {
    %c0_i32 = arith.constant 0 : i32
    %c0_i32_0 = arith.constant 0 : i32
    return %arg0, %c0_i32 : i32, i32
  }
}

</mosaic_0001>

<bundles_post_ra>
// kernel: tpu_custom_call.1
= control target key start
LH: loop header
LB: loop body
LE: loop exit
PB: predicated region body
PF: predicated region fallthrough
CT: control target
= control target key end

     0   :  { %6 = vsyncpa [#allocation3], 0  ;;  %s453_s0 = inlined_call_operand.hbm [shape: f32[8,128], index: 0, kind: input, shape index: {}]   ;;  %s454_s1 = inlined_call_operand.hbm [shape: f32[16,128], index: 1, kind: output, shape index: {}]  }
   0x1   :  { %7 = vsyncpa [#allocation4], 0 }
   0x2   :  { %9 = vsyncpa [#allocation4 + $0x1], 0  ;;  %s347_s6 = smov 0   ;;  %s349_s7 = smov 0  }
   0x3   :  { %s351_s8 = smov 0   ;;  %s353_s9 = smov 0  }
   0x4 LB: > { %s368_s10 = sadd.s32 4294967295, %s333_s9   ;;  %s183_s11 = sadd.s32 4294967294, %s333_s9   ;;  %s333_s9 = sphi %s353_s9, %s462_s9   ;;  %s329_s8 = sphi %s351_s8, %s461_s8   ;;  %s325_s7 = sphi %s349_s7, %s460_s7   ;;  %s321_s6 = sphi %s347_s6, %s459_s6  }
   0x5   : > { %s372_s12 = sadd.s32 1, %s333_s9   ;;  %s43_s13 = sadd.s32 1, %s329_s8 }
   0x6   : > { %s40_s14 = ssub.s32 %s333_s9, %s372_s12  ;;  %p53_p0 = scmp.ne.s32.totalorder %s329_s8, %s325_s7 }
   0x7   : > { %p41_p1 = scmp.eq.s32.totalorder %s40_s14, 0  ;;  %p54_p2 = scmp.eq.s32.totalorder %s368_s10, 1 }
   0x8   : > { %p59_p3 = scmp.ne.s32.totalorder %s325_s7, %s321_s6  ;;  %p60_p4 = scmp.eq.s32.totalorder %s183_s11, 1 }
   0x9   : > { %s383_s15 = scalar_select %p41_p1, %s329_s8, %s43_s13  }
   0xa   : > { %p385_p5 = por %p54_p2, %p53_p0  ;;  %p389_p6 = por %p60_p4, %p59_p3 }
   0xb   : > { %p184_p7 = scmp.ge.s32.totalorder %s333_s9, 1  ;;  %p67_p8 = scmp.lt.s32.totalorder %s333_s9, 3 }
   0xc   : > { %s456_s17 = scalar_select %p389_p6, 1, 0 }
   0xd   : > { %p207_p9 = scmp.eq.s32.totalorder %s368_s10, 0  ;;  %p396_p10 = pnand %p184_p7, %p67_p8 }
   0xe   : > { %s335_s19 = smov [#allocation2]  }
   0xf   : > { %s80_s20 = sshll.u32 %s335_s19, 4  ;;  %p199_p11 = pneg %p396_p10  ;;  %s81_s20 = int_to_ptr.vmem [resolvable:$true] %s80_s20 }
  0x10   : > { %s254_s21 = scalar_lea.vmem %s81_s20, 128  ;;  %p262_p3 = scmp.lt.s32.totalorder %s81_s20, %s81_s20 }
  0x11   : > { %p200_p12 = pnand %p207_p9, %p199_p11  ;;  %p255_p0 = scmp.ne.s32.totalorder %s81_s20, %s254_s21 }
  0x12   : > { %p263_p4 = scmp.lt.s32.totalorder %s254_s21, %s254_s21 }
  0x13   : > { %p245_p13 = pneg %p200_p12 }
  0x14   : > { %p264_p6 = por %p263_p4, %p262_p3 }
  0x15   : > { %p257_p1 = pnand %p255_p0, %p245_p13 }
  0x17   : > { %p258_p2 = pneg %p257_p1 }
  0x19   : > { %p265_p7 = pnand %p264_p6, %p258_p2 }
  0x1b   : > { %268 = shalt.err (!%p265_p7)
}
  0x1c   : > { %202 = dma.hbm_to_vmem [thread:$0]  (!%p200_p12), %s453_s0, 128, %s81_s20, [#allocation3]  }
  0x1d   : > { %93 = sbr.rel (%p396_p10) target bundleno = 60 (0x3c), region = 24 }
  0x22   : > { %312 = dma.done.wait (%p207_p9), [#allocation3], 128  }
  0x23   : > { %314 = vsyncadd (%p207_p9), [#allocation3], 4294967168  ;;  %s105_s24 = sand.u32 1, %s325_s7   ;;  %s190_s28 = sshll.u32 %s368_s10, 7  ;;  %v108_v0 = vld [vmem:[#allocation2] sm:$0xff] }
  0x24   : > { %s188_s25 = sshll.u32 %s105_s24, 3  ;;  %s122_s2 = scalar_lea.hbm %s454_s1, %s190_s28 }
  0x25   : > { %s107_s26 = scalar_lea.vmem [#allocation5], %s188_s25  ;;  %s111_s3 = scalar_lea.sflag [#allocation4], %s105_s24 }
  0x26   : > { %s124_s27 = sshll.u32 %s107_s26, 4  ;;  %109 = vst [vmem:[%s107_s26] sm:$0xff] %v108_v0  ;;  %s336_s5 = smov [#allocation5]   ;;  %s415_s27 = int_to_ptr.vmem [resolvable:$true] %s124_s27 }
  0x27   : > { %s269_s4 = scalar_lea.vmem %s415_s27, 128  ;;  %s273_s11 = sshll.u32 %s336_s5, 4  ;;  %s274_s11 = int_to_ptr.vmem [resolvable:$false] %s273_s11 }
  0x28   : > { %p270_p6 = scmp.ne.s32.totalorder %s415_s27, %s269_s4  ;;  %s275_s10 = scalar_lea.vmem %s274_s11, 256 }
  0x29   : > { %p276_p10 = scmp.lt.s32.totalorder %s415_s27, %s274_s11  ;;  %p277_p11 = scmp.lt.s32.totalorder %s275_s10, %s269_s4 }
  0x2a   : > { %p271_p8 = pnand %p270_p6, %p385_p5 }
  0x2b   : > { %p278_p12 = por %p277_p11, %p276_p10 }
  0x2c   : > { %p272_p9 = pneg %p271_p8 }
  0x2e   : > { %p279_p13 = pnand %p278_p12, %p272_p9 }
  0x30   : > { %282 = shalt.err (!%p279_p13)
}
  0x31   : > { %s283_s13 = scalar_lea.hbm %s122_s2, 128  ;;  %s287_s19 = scalar_lea.hbm %s454_s1, 256 }
  0x32   : > { %p284_p0 = scmp.ne.s32.totalorder %s122_s2, %s283_s13  ;;  %p288_p3 = scmp.lt.s32.totalorder %s122_s2, %s454_s1 }
  0x33   : > { %p289_p4 = scmp.lt.s32.totalorder %s287_s19, %s283_s13 }
  0x34   : > { %p285_p1 = pnand %p284_p0, %p385_p5 }
  0x35   : > { %p290_p7 = por %p289_p4, %p288_p3 }
  0x36   : > { %p286_p2 = pneg %p285_p1 }
  0x38   : > { %p291_p6 = pnand %p290_p7, %p286_p2 }
  0x3a   : > { %294 = shalt.err (!%p291_p6)
}
  0x3b   : > { %197 = dma.vmem_to_hbm [thread:$0]  (%p385_p5), %s415_s27, 128, %s122_s2, %s111_s3  }
  0x3c PF: > { %p209_p8 = scmp.ge.s32.totalorder %s333_s9, 2  ;;  %s136_s22 = sand.u32 1, %s321_s6  }
  0x3d   : > { %p458_p9 = scmp.ne.s32.totalorder %s456_s17, 0  ;;  %s137_s23 = scalar_lea.sflag [#allocation4], %s136_s22 }
  0x3f   : > { %p204_p10 = pnand %p209_p8, %p458_p9 }
  0x41   : > { %p205_p11 = pneg %p204_p10 }
  0x43   : > { %316 = dma.done.wait (%p205_p11), %s137_s23, 128  }
  0x44   : > { %318 = vsyncadd (%p205_p11), %s137_s23, 4294967168  ;;  %p12_p12 = scmp.ge.s32.totalorder %s372_s12, 4   ;;  %s459_s6 = smov %s325_s7 }
  0x45   : > { %s460_s7 = smov %s329_s8  ;;  %s461_s8 = smov %s383_s15 }
  0x46   : > { %s462_s9 = smov %s372_s12  ;;  %14 = sbr.rel (!%p12_p12) target bundleno = 4 (0x4), region = 61 }
  0x4b   :  { %142 = vsyncpa [#allocation3], 1 }
  0x4c   :  { %144 = vsyncpa [#allocation3 + $0x1], 1 }
  0x4d   :  { %145 = vsyncpa [#allocation4], 1 }
  0x4e   :  { %147 = vsyncpa [#allocation4 + $0x1], 1 }

// kernel: apply.1
= control target key start
LH: loop header
LB: loop body
LE: loop exit
PB: predicated region body
PF: predicated region fallthrough
CT: control target
= control target key end

     0   :  { %10 = vsyncpa [#allocation3], 0  ;;  %s748_s0 = inlined_call_operand.vmem [shape: bf16[16,256], index: 0, kind: input, shape index: {}]   ;;  %s749_s1 = inlined_call_operand.hbm [shape: bf16[256,256], index: 1, kind: input, shape index: {}]   ;;  %s750_s2 = inlined_call_operand.vmem [shape: f32[1,256], index: 2, kind: input, shape index: {}]   ;;  %s751_s3 = inlined_call_operand.hbm [shape: bf16[256,128], index: 3, kind: input, shape index: {}]   ;;  %s752_s4 = inlined_call_operand.vmem [shape: f32[1,128], index: 4, kind: input, shape index: {}]   ;;  %s753_s5 = inlined_call_operand.vmem [shape: f32[16,128], index: 5, kind: output, shape index: {}]  }
   0x1   :  { %11 = vsyncpa [#allocation5], 0  ;;  %s688_s18 = smov [#allocation2]  }
   0x2   :  { %s19_s19 = sshll.u32 %s688_s18, 4  ;;  %s20_s19 = int_to_ptr.vmem [resolvable:$true] %s19_s19 }
   0x3   :  { %s652_s20 = scalar_lea.vmem %s20_s19, 4096  ;;  %p657_p1 = scmp.lt.s32.totalorder %s20_s19, %s20_s19 }
   0x4   :  { %p653_p0 = scmp.ne.s32.totalorder %s20_s19, %s652_s20  ;;  %p658_p2 = scmp.lt.s32.totalorder %s652_s20, %s652_s20 }
   0x6   :  { %p659_p3 = por %p658_p2, %p657_p1 }
   0x8   :  { %p660_p4 = pnand %p659_p3, %p653_p0 }
   0xa   :  { %663 = shalt.err (!%p660_p4)
}
   0xb   :  { %s689_s21 = smov 128   ;;  %s690_s22 = smov 8  }
   0xc   :  { %25 = dma.hbm_to_vmem [thread:$0]  %s749_s1, 4096, %s20_s19, [#allocation3], %s689_s21, %s689_s21, %s690_s22  }
   0xd   :  { %s691_s25 = smov [#allocation4]  }
   0xe   :  { %s33_s26 = sshll.u32 %s691_s25, 4  ;;  %s34_s26 = int_to_ptr.vmem [resolvable:$true] %s33_s26 }
   0xf   :  { %s672_s27 = scalar_lea.vmem %s34_s26, 2048  ;;  %p677_p6 = scmp.lt.s32.totalorder %s34_s26, %s34_s26 }
  0x10   :  { %p673_p5 = scmp.ne.s32.totalorder %s34_s26, %s672_s27  ;;  %p678_p7 = scmp.lt.s32.totalorder %s672_s27, %s672_s27 }
  0x12   :  { %p679_p8 = por %p678_p7, %p677_p6 }
  0x14   :  { %p680_p9 = pnand %p679_p8, %p673_p5 }
  0x16   :  { %683 = shalt.err (!%p680_p9)
}
  0x17   :  { %s692_s28 = smov 64   ;;  %s693_s29 = smov 4  }
  0x18   :  { %39 = dma.hbm_to_vmem [thread:$0]  %s751_s3, 2048, %s34_s26, [#allocation5], %s692_s28, %s692_s28, %s693_s29  }
  0x19   :  { %684 = dma.done.wait [#allocation3], 4096  }
  0x1a   :  { %685 = vsyncadd [#allocation3], 4294963200 }
  0x1b   :  { %686 = dma.done.wait [#allocation5], 2048  }
  0x1c   :  { %687 = vsyncadd [#allocation5], 4294965248  ;;  %v577_v0 = vld [vmem:[#allocation2 + $0x74] ss:$8 sps:$4 sm:$0xff]   ;;  %v579_v1 = vld [vmem:[#allocation2 + $0x70] ss:$8 sps:$4 sm:$0xff]   ;;  %v85_v50 = vlaneseq }
  0x1d   :  { %265 = vmatprep.subr.bf16.mxu0 %v577_v0  ;;  %v580_v2 = vld [vmem:[#allocation2 + $0x64] ss:$8 sps:$4 sm:$0xff]   ;;  %v582_v3 = vld [vmem:[#allocation2 + $0x60] ss:$8 sps:$4 sm:$0xff]   ;;  %v583_v4 = vld [vmem:[#allocation2 + $0x54] ss:$8 sps:$4 sm:$0xff]  }
  0x1e   :  { %266 = vmatpush1.bf16.msra.mxu0 %v579_v1  ;;  %v585_v5 = vld [vmem:[#allocation2 + $0x50] ss:$8 sps:$4 sm:$0xff]   ;;  %v586_v6 = vld [vmem:[#allocation2 + $0x44] ss:$8 sps:$4 sm:$0xff]   ;;  %v588_v7 = vld [vmem:[#allocation2 + $0x40] ss:$8 sps:$4 sm:$0xff]  }
  0x1f   :  { %267 = vmatprep.subr.bf16.mxu0 %v580_v2  ;;  %v589_v8 = vld [vmem:[#allocation2 + $0x34] ss:$8 sps:$4 sm:$0xff]   ;;  %v591_v9 = vld [vmem:[#allocation2 + $0x30] ss:$8 sps:$4 sm:$0xff]   ;;  %v592_v10 = vld [vmem:[#allocation2 + $0x24] ss:$8 sps:$4 sm:$0xff]  }
  0x20   :  { %v594_v11 = vld [vmem:[#allocation2 + $0x20] ss:$8 sps:$4 sm:$0xff]   ;;  %v595_v12 = vld [vmem:[#allocation2 + $0x14] ss:$8 sps:$4 sm:$0xff]   ;;  %v597_v13 = vld [vmem:[#allocation2 + $0x10] ss:$8 sps:$4 sm:$0xff]  }
  0x21   :  { %v598_v14 = vld [vmem:[#allocation2 + $0x4] ss:$8 sps:$4 sm:$0xff]   ;;  %v628_v16 = vld [vmem:[#allocation4 + $0x78] sm:$0xff]   ;;  %v600_v18 = vld [vmem:[#allocation2] ss:$8 sps:$4 sm:$0xff]   ;;  %v86_v51 = vshrl.u32 %v85_v50, 7 }
  0x22   :  { %268 = vmatpush1.bf16.msra.mxu0 %v582_v3  ;;  %v627_v15 = vld [vmem:[%s748_s0 + $0x4] ss:$8 sps:$4 sm:$0xff]   ;;  %v629_v17 = vld [vmem:[#allocation4 + $0x38] sm:$0xff]   ;;  %549 = vmatprep.subr.bf16.mxu1 %v628_v16  ;;  %v630_v19 = vld [vmem:[#allocation4 + $0x70] sm:$0xff]  }
  0x23   :  { %269 = vmatprep.subr.bf16.mxu0 %v583_v4  ;;  %297 = vmatprep.mubr.bf16.mxu0 %v627_v15  ;;  %v631_v20 = vld [vmem:[#allocation4 + $0x30] sm:$0xff]   ;;  %v632_v21 = vld [vmem:[#allocation4 + $0x68] sm:$0xff]   ;;  %v634_v25 = vld [vmem:[#allocation4 + $0x60] sm:$0xff]   ;;  %v91_v52 = vsub.s32 1, %v86_v51  ;;  %v87_v53 = vsub.s32 0, %v86_v51 }
  0x24   :  { %550 = vmatpush3.bf16.msra.mxu1 %v629_v17  ;;  %v601_v22 = vld [vmem:[#allocation2 + $0xf4] ss:$8 sps:$4 sm:$0xff]   ;;  %v603_v23 = vld [vmem:[#allocation2 + $0xf0] ss:$8 sps:$4 sm:$0xff]   ;;  %v633_v24 = vld [vmem:[#allocation4 + $0x28] sm:$0xff]  }
  0x25   :  { %551 = vmatprep.subr.bf16.mxu1 %v630_v19  ;;  %v604_v26 = vld [vmem:[#allocation2 + $0xe4] ss:$8 sps:$4 sm:$0xff]   ;;  %v606_v28 = vld [vmem:[#allocation2 + $0xe0] ss:$8 sps:$4 sm:$0xff]   ;;  %v636_v29 = vld [vmem:[#allocation4 + $0x58] sm:$0xff]  }
  0x26   :  { %270 = vmatpush1.bf16.msra.mxu0 %v585_v5  ;;  %v635_v27 = vld [vmem:[#allocation4 + $0x20] sm:$0xff]   ;;  %v607_v30 = vld [vmem:[#allocation2 + $0xd4] ss:$8 sps:$4 sm:$0xff]   ;;  %v609_v32 = vld [vmem:[#allocation2 + $0xd0] ss:$8 sps:$4 sm:$0xff]  }
  0x27   :  { %271 = vmatprep.subr.bf16.mxu0 %v586_v6  ;;  %v637_v31 = vld [vmem:[#allocation4 + $0x18] sm:$0xff]   ;;  %v610_v33 = vld [vmem:[#allocation2 + $0xc4] ss:$8 sps:$4 sm:$0xff]   ;;  %v612_v34 = vld [vmem:[#allocation2 + $0xc0] ss:$8 sps:$4 sm:$0xff]  }
  0x28   :  { %552 = vmatpush3.bf16.msra.mxu1 %v631_v20  ;;  %v613_v35 = vld [vmem:[#allocation2 + $0xb4] ss:$8 sps:$4 sm:$0xff]   ;;  %v615_v36 = vld [vmem:[#allocation2 + $0xb0] ss:$8 sps:$4 sm:$0xff]   ;;  %v616_v37 = vld [vmem:[#allocation2 + $0xa4] ss:$8 sps:$4 sm:$0xff]  }
  0x29   :  { %553 = vmatprep.subr.bf16.mxu1 %v632_v21  ;;  %v618_v38 = vld [vmem:[#allocation2 + $0xa0] ss:$8 sps:$4 sm:$0xff]   ;;  %v619_v39 = vld [vmem:[#allocation2 + $0x94] ss:$8 sps:$4 sm:$0xff]   ;;  %v621_v40 = vld [vmem:[#allocation2 + $0x90] ss:$8 sps:$4 sm:$0xff]  }
  0x2a   :  { %272 = vmatpush1.bf16.msra.mxu0 %v588_v7  ;;  %v622_v41 = vld [vmem:[#allocation2 + $0x84] ss:$8 sps:$4 sm:$0xff]   ;;  %v624_v42 = vld [vmem:[#allocation2 + $0x80] ss:$8 sps:$4 sm:$0xff]   ;;  %v638_v44 = vld [vmem:[#allocation4 + $0x50] sm:$0xff]  }
  0x2b   :  { %273 = vmatprep.subr.bf16.mxu0 %v589_v8  ;;  %v625_v43 = vld [vmem:[%s748_s0] ss:$8 sps:$4 sm:$0xff]   ;;  %v639_v45 = vld [vmem:[#allocation4 + $0x10] sm:$0xff]  }
  0x2c   :  { %554 = vmatpush3.bf16.msra.mxu1 %v633_v24  ;;  %v640_v46 = vld [vmem:[#allocation4 + $0x48] sm:$0xff]   ;;  %v642_v48 = vld [vmem:[#allocation4 + $0x40] sm:$0xff]  }
  0x2d   :  { %555 = vmatprep.subr.bf16.mxu1 %v634_v25  ;;  %v641_v47 = vld [vmem:[#allocation4 + $0x8] sm:$0xff]   ;;  %v643_v49 = vld [vmem:[#allocation4] sm:$0xff]  }
  0x2e   :  { %274 = vmatpush1.bf16.msra.mxu0 %v591_v9  ;;  %v83_v54 = vld [vmem:[%s750_s2] sm:$0x3] }
  0x2f   :  { %275 = vmatprep.subr.bf16.mxu0 %v592_v10  ;;  %v92_v56 = vrot.slane %v83_v54, %v91_v52  ;;  %v88_v57 = vrot.slane %v83_v54, %v87_v53  ;;  %v532_v8 = vld [vmem:[%s752_s4] ss:$0 sm:$0xff] }
  0x30   :  { %556 = vmatpush3.bf16.msra.mxu1 %v635_v27 }
  0x31   :  { %557 = vmatprep.subr.bf16.mxu1 %v636_v29 }
  0x32   :  { %276 = vmatpush1.bf16.msra.mxu0 %v594_v11 }
  0x33   :  { %277 = vmatprep.subr.bf16.mxu0 %v595_v12 }
  0x34   :  { %558 = vmatpush3.bf16.msra.mxu1 %v637_v31 }
  0x35   :  { %559 = vmatprep.subr.bf16.mxu1 %v638_v44 }
  0x36   :  { %278 = vmatpush1.bf16.msra.mxu0 %v597_v13 }
  0x37   :  { %279 = vmatprep.subr.bf16.mxu0 %v598_v14 }
  0x38   :  { %560 = vmatpush3.bf16.msra.mxu1 %v639_v45 }
  0x39   :  { %561 = vmatprep.subr.bf16.mxu1 %v640_v46 }
  0x3a   :  { %280 = vmatpush1.bf16.msra.mxu0 %v600_v18 }
  0x3b   :  { %281 = vmatprep.subr.bf16.mxu0 %v601_v22 }
  0x3c   :  { %562 = vmatpush3.bf16.msra.mxu1 %v641_v47 }
  0x3d   :  { %563 = vmatprep.subr.bf16.mxu1 %v642_v48 }
  0x3e   :  { %282 = vmatpush2.bf16.msra.mxu0 %v603_v23 }
  0x3f   :  { %283 = vmatprep.subr.bf16.mxu0 %v604_v26 }
  0x40   :  { %564 = vmatpush3.bf16.msra.mxu1 %v643_v49 }
  0x42   :  { %284 = vmatpush2.bf16.msra.mxu0 %v606_v28 }
  0x43   :  { %285 = vmatprep.subr.bf16.mxu0 %v607_v30 }
  0x46   :  { %286 = vmatpush2.bf16.msra.mxu0 %v609_v32 }
  0x47   :  { %287 = vmatprep.subr.bf16.mxu0 %v610_v33 }
  0x4a   :  { %288 = vmatpush2.bf16.msra.mxu0 %v612_v34 }
  0x4b   :  { %289 = vmatprep.subr.bf16.mxu0 %v613_v35 }
  0x4e   :  { %290 = vmatpush2.bf16.msra.mxu0 %v615_v36 }
  0x4f   :  { %291 = vmatprep.subr.bf16.mxu0 %v616_v37 }
  0x52   :  { %292 = vmatpush2.bf16.msra.mxu0 %v618_v38 }
  0x53   :  { %293 = vmatprep.subr.bf16.mxu0 %v619_v39 }
  0x56   :  { %294 = vmatpush2.bf16.msra.mxu0 %v621_v40 }
  0x57   :  { %295 = vmatprep.subr.bf16.mxu0 %v622_v41 }
  0x5a   :  { %296 = vmatpush2.bf16.msra.mxu0 %v624_v42 }
  0x5d   :  { %298 = vmatmul.mubr.bf16.vlgmr.msra.gmra.mxu0 %v625_v43 }
 0x11d   :  { %v299_v55 = vpop.f32.mrf.mxu0 }
 0x11e   :  { %v300_v62 = vadd.f32 %v299_v55, %v88_v57 }
 0x11f   :  { %v301_v58 = vpop.f32.mrf.mxu0 }
 0x120   :  { %v302_v60 = vadd.f32 %v301_v58, %v92_v56  ;;  %v308_v4 = vmax.f32 %v300_v62, 0.0 }
 0x121   :  { %v303_v59 = vpop.f32.mrf.mxu0 }
 0x122   :  { %v304_v61 = vadd.f32 %v303_v59, %v88_v57  ;;  %v309_v2 = vmax.f32 %v302_v60, 0.0 }
 0x123   :  { %v305_v63 = vpop.f32.mrf.mxu0 }
 0x124   :  { %v306_v0 = vadd.f32 %v305_v63, %v92_v56  ;;  %v310_v1 = vmax.f32 %v304_v61, 0.0 }
 0x126   :  { %v311_v3 = vmax.f32 %v306_v0, 0.0  ;;  %v312_v6 = vpack.c.bf16 %v310_v1, %v308_v4 }
 0x128   :  { %v313_v5 = vpack.c.bf16 %v311_v3, %v309_v2 }
 0x12a   :  { %481 = vmatprep.mubr.bf16.mxu1 %v313_v5 }
 0x12b   :  { %482 = vmatmul.mubr.bf16.vlgmr.msra.gmra.mxu1 %v312_v6 }
 0x1eb   :  { %v565_v7 = vpop.f32.mrf.mxu1 }
 0x1ed   :  { %v566_v9 = vpop.f32.mrf.mxu1 }
 0x1ee   :  { %v567_v10 = vadd.f32 %v566_v9, %v565_v7 }
 0x1ef   :  { %v568_v11 = vpop.f32.mrf.mxu1 }
 0x1f0   :  { %v484_v12 = vadd.f32 %v567_v10, %v532_v8 }
 0x1f1   :  { %v569_v13 = vpop.f32.mrf.mxu1 }
 0x1f2   :  { %490 = vst [vmem:[%s753_s5] sm:$0xff] %v484_v12  ;;  %v570_v14 = vadd.f32 %v569_v13, %v568_v11 }
 0x1f4   :  { %v487_v15 = vadd.f32 %v570_v14, %v532_v8 }
 0x1f6   :  { %491 = vst [vmem:[%s753_s5 + $0x8] sm:$0xff] %v487_v15 }
 0x1f7   :  { %496 = vsyncpa [#allocation3], 1 }
 0x1f8   :  { %497 = vsyncpa [#allocation5], 1 }

</bundles_post_ra>
